<compile_context>
chip_gen: v5e
topology: v5e:2x2
jax: 0.10.0
libtpu: 0.0.40
codegen_flags: <defaults>
</compile_context>

<pallas_src>
import functools

import jax
import jax.numpy as jnp
from jax.experimental import pallas as pl
from jax.experimental.pallas import tpu as pltpu

SUBLANE = 8  # vreg sublane width (second-to-last dim granularity)


def _round_up(n, m):
    return ((n + m - 1) // m) * m


def dvqc_kernel(x_ref, w1_ref, b1_ref, w2_ref, b2_ref, o_ref):
    # Fused cast: x arrives raw f32 from HBM, cast to bf16 on the VPU (free
    # under the DMA in this mem-bound kernel) before feeding the MXU.
    x_bf = x_ref[...].astype(jnp.bfloat16)
    # q_net_1: affine. bf16 operands on the MXU, f32 accumulation + f32 bias.
    h = jnp.dot(x_bf, w1_ref[...], preferred_element_type=jnp.float32)
    h = h + b1_ref[...]
    # q_net_2: affine. Re-enter the MXU in bf16, accumulate f32, bias in f32.
    y = jnp.dot(h.astype(jnp.bfloat16), w2_ref[...],
                preferred_element_type=jnp.float32)
    y = y + b2_ref[...]
    o_ref[...] = y.astype(o_ref.dtype)


def prep_dvqc_params(w1, b1, w2, b2):
    """One-time parameter prep (do this at load time, NOT per forward call).

    Weights are stored pre-transposed as (in_features, out_features) so the
    kernel computes y = x @ W + b directly on the MXU; they are cast to bf16
    (MXU operand dtype). Biases stay f32 (accumulator dtype), shaped (1, N).
    """
    return (w1.astype(jnp.bfloat16),
            jnp.asarray(b1, jnp.float32).reshape(1, -1),
            w2.astype(jnp.bfloat16),
            jnp.asarray(b2, jnp.float32).reshape(1, -1))


@functools.partial(jax.jit, static_argnames=("batch_tile",))
def dvqc_net_forward(x, w1_bf16, b1_f32, w2_bf16, b2_f32, *, batch_tile=512):
    """x: (B, D_IN) f32; params pre-prepped by prep_dvqc_params."""
    B, d_in = x.shape
    hid = w1_bf16.shape[1]
    d_out = w2_bf16.shape[1]

    # Batch tiling: round to a sublane multiple, cap the tile so the grid has
    # >= 2 steps whenever the batch allows it (v7x: 2 TensorCores share the
    # "parallel" axis), but never exceed batch_tile.
    b_pad = _round_up(B, SUBLANE)
    tb = min(batch_tile, max(SUBLANE, _round_up(b_pad // 2, SUBLANE)))
    b_pad = _round_up(b_pad, tb)
    grid = (b_pad // tb,)

    # Only the batch dim ever needs padding (and only when B isn't already a
    # tile multiple) — no feature-dim padding, no dtype change in the wrapper.
    xp = x if b_pad == B else jnp.pad(x, ((0, b_pad - B), (0, 0)))

    out = pl.pallas_call(
        dvqc_kernel,
        out_shape=jax.ShapeDtypeStruct((b_pad, d_out), x.dtype),
        grid=grid,
        in_specs=[
            # Activations follow the batch grid (double-buffered by Pallas).
            # Last dim = full array dim (d_in) -> legal block even though < 128.
            pl.BlockSpec((tb, d_in), lambda i: (i, 0)),
            # Weights / biases: same block every grid step -> VMEM-resident.
            pl.BlockSpec((d_in, hid), lambda i: (0, 0)),
            pl.BlockSpec((1, hid), lambda i: (0, 0)),
            pl.BlockSpec((hid, d_out), lambda i: (0, 0)),
            pl.BlockSpec((1, d_out), lambda i: (0, 0)),
        ],
        # Unpadded feature dim: writes only the real d_out lanes per row.
        out_specs=pl.BlockSpec((tb, d_out), lambda i: (i, 0)),
        compiler_params=pltpu.CompilerParams(
            # Batch tiles are independent -> shard across TensorCores (v7x).
            dimension_semantics=("parallel",),
        ),
    )(xp, w1_bf16, b1_f32, w2_bf16, b2_f32)

    # Only the (rare) batch padding is sliced off; no feature-dim depad.
    return out if b_pad == B else out[:B]


if __name__ == "__main__":
    # Small-but-tiled problem: 256 rows -> grid of 2 batch tiles of 128.
    B, D_IN, HID, D_OUT = 256, 32, 32, 32

    key = jax.random.PRNGKey(0)
    kx, k1, k2, k3, k4 = jax.random.split(key, 5)

    x = jax.random.normal(kx, (B, D_IN), dtype=jnp.float32)

    # Deterministic synthetic parameters (PyTorch Linear stores W as (out, in);
    # kept pre-transposed to (in, out) for x @ W).
    w1 = jax.random.normal(k1, (D_IN, HID), dtype=jnp.float32) * 0.1
    b1 = jax.random.normal(k2, (HID,), dtype=jnp.float32) * 0.1
    w2 = jax.random.normal(k3, (HID, D_OUT), dtype=jnp.float32) * 0.1
    b2 = jax.random.normal(k4, (D_OUT,), dtype=jnp.float32) * 0.1

    # One-time parameter prep (hoisted out of the per-call path).
    w1p, b1p, w2p, b2p = prep_dvqc_params(w1, b1, w2, b2)

    out = dvqc_net_forward(x, w1p, b1p, w2p, b2p)
    out = jax.block_until_ready(out)

    # Pure-JAX references of the same composition.
    ref_f32 = (x @ w1 + b1[None, :]) @ w2 + b2[None, :]     # full f32 reference
    h_bf = (x.astype(jnp.bfloat16) @ w1.astype(jnp.bfloat16)).astype(
        jnp.float32) + b1[None, :]                           # bf16-consistent ref
    ref_bf16 = (h_bf.astype(jnp.bfloat16) @ w2.astype(jnp.bfloat16)).astype(
        jnp.float32) + b2[None, :]

    assert out.shape == (B, D_OUT)
    # Tight check against the bf16-consistent reference, loose vs. pure f32.
    assert jnp.allclose(out, ref_bf16, atol=1e-2, rtol=1e-2)
    assert jnp.allclose(out, ref_f32, atol=5e-2, rtol=5e-2)

    # TODO(synk): q_net_1 / q_net_2 are injected dependencies in the PyTorch
    # module (often quantum TorchLayers); here they are instantiated as affine
    # layers since no concrete definition is provided.
    print("KERNEL_OK")
</pallas_src>

<mosaic_0001>
module attributes {stable_mosaic.version = 11 : i64} {
  func.func @dvqc_kernel(%arg0: i32, %arg1: memref<128x32xf32, #tpu.memory_space<vmem>>, %arg2: memref<32x32xbf16, #tpu.memory_space<vmem>>, %arg3: memref<1x32xf32, #tpu.memory_space<vmem>>, %arg4: memref<32x32xbf16, #tpu.memory_space<vmem>>, %arg5: memref<1x32xf32, #tpu.memory_space<vmem>>, %arg6: memref<128x32xf32, #tpu.memory_space<vmem>>) attributes {dimension_semantics = [#tpu.dimension_semantics<parallel>], iteration_bounds = array<i64: 2>, scalar_prefetch = 0 : i64, scratch_operands = 0 : i64, tpu.core_type = #tpu.core_type<tc>, window_params = [{transform_indices = @transform_0, window_bounds = array<i64: 128, 32>}, {pipeline_mode = #tpu.pipeline_mode<synchronous>, transform_indices = @transform_1, window_bounds = array<i64: 32, 32>}, {pipeline_mode = #tpu.pipeline_mode<synchronous>, transform_indices = @transform_2, window_bounds = array<i64: 1, 32>}, {pipeline_mode = #tpu.pipeline_mode<synchronous>, transform_indices = @transform_3, window_bounds = array<i64: 32, 32>}, {pipeline_mode = #tpu.pipeline_mode<synchronous>, transform_indices = @transform_4, window_bounds = array<i64: 1, 32>}, {transform_indices = @transform_5, window_bounds = array<i64: 128, 32>}]} {
    %c0 = arith.constant 0 : index
    %c0_0 = arith.constant 0 : index
    %0 = vector.load %arg1[%c0, %c0_0] : memref<128x32xf32, #tpu.memory_space<vmem>>, vector<128x32xf32>
    %1 = arith.truncf %0 : vector<128x32xf32> to vector<128x32xbf16>
    %c0_1 = arith.constant 0 : index
    %c0_2 = arith.constant 0 : index
    %2 = vector.load %arg2[%c0_1, %c0_2] : memref<32x32xbf16, #tpu.memory_space<vmem>>, vector<32x32xbf16>
    %cst = arith.constant dense<0.000000e+00> : vector<128x32xf32>
    %3 = tpu.matmul %1, %2, %cst {dimension_numbers = #tpu.dot_dimension_numbers<[1], [0], [0], [1], [0, 0, 1, 1], [], []>} : vector<128x32xbf16>, vector<32x32xbf16>, vector<128x32xf32> -> vector<128x32xf32>
    %c0_3 = arith.constant 0 : index
    %c0_4 = arith.constant 0 : index
    %4 = vector.load %arg3[%c0_3, %c0_4] : memref<1x32xf32, #tpu.memory_space<vmem>>, vector<1x32xf32>
    %5 = vector.broadcast %4 : vector<1x32xf32> to vector<128x32xf32>
    %6 = arith.addf %3, %5 : vector<128x32xf32>
    %7 = arith.truncf %6 : vector<128x32xf32> to vector<128x32xbf16>
    %c0_5 = arith.constant 0 : index
    %c0_6 = arith.constant 0 : index
    %8 = vector.load %arg4[%c0_5, %c0_6] : memref<32x32xbf16, #tpu.memory_space<vmem>>, vector<32x32xbf16>
    %cst_7 = arith.constant dense<0.000000e+00> : vector<128x32xf32>
    %9 = tpu.matmul %7, %8, %cst_7 {dimension_numbers = #tpu.dot_dimension_numbers<[1], [0], [0], [1], [0, 0, 1, 1], [], []>} : vector<128x32xbf16>, vector<32x32xbf16>, vector<128x32xf32> -> vector<128x32xf32>
    %c0_8 = arith.constant 0 : index
    %c0_9 = arith.constant 0 : index
    %10 = vector.load %arg5[%c0_8, %c0_9] : memref<1x32xf32, #tpu.memory_space<vmem>>, vector<1x32xf32>
    %11 = vector.broadcast %10 : vector<1x32xf32> to vector<128x32xf32>
    %12 = arith.addf %9, %11 : vector<128x32xf32>
    %c0_10 = arith.constant 0 : index
    %c0_11 = arith.constant 0 : index
    %13 = vector.load %arg6[%c0_10, %c0_11] : memref<128x32xf32, #tpu.memory_space<vmem>>, vector<128x32xf32>
    tpu.vector_store %arg6[%c0_10, %c0_11], %12 {strides = array<i32>} : memref<128x32xf32, #tpu.memory_space<vmem>>, vector<128x32xf32>,
    return
  }
  func.func @transform_0(%arg0: i32) -> (i32, i32) {
    %c0_i32 = arith.constant 0 : i32
    %c0_i32_0 = arith.constant 0 : i32
    return %arg0, %c0_i32 : i32, i32
  }
  func.func @transform_1(%arg0: i32) -> (i32, i32) {
    %c0_i32 = arith.constant 0 : i32
    %c0_i32_0 = arith.constant 0 : i32
    %c0_i32_1 = arith.constant 0 : i32
    return %c0_i32, %c0_i32_0 : i32, i32
  }
  func.func @transform_2(%arg0: i32) -> (i32, i32) {
    %c0_i32 = arith.constant 0 : i32
    %c0_i32_0 = arith.constant 0 : i32
    %c0_i32_1 = arith.constant 0 : i32
    return %c0_i32, %c0_i32_0 : i32, i32
  }
  func.func @transform_3(%arg0: i32) -> (i32, i32) {
    %c0_i32 = arith.constant 0 : i32
    %c0_i32_0 = arith.constant 0 : i32
    %c0_i32_1 = arith.constant 0 : i32
    return %c0_i32, %c0_i32_0 : i32, i32
  }
  func.func @transform_4(%arg0: i32) -> (i32, i32) {
    %c0_i32 = arith.constant 0 : i32
    %c0_i32_0 = arith.constant 0 : i32
    %c0_i32_1 = arith.constant 0 : i32
    return %c0_i32, %c0_i32_0 : i32, i32
  }
  func.func @transform_5(%arg0: i32) -> (i32, i32) {
    %c0_i32 = arith.constant 0 : i32
    %c0_i32_0 = arith.constant 0 : i32
    return %arg0, %c0_i32 : i32, i32
  }
}

</mosaic_0001>

<bundles_post_ra>
// kernel: dvqc_net_forward.1
= control target key start
LH: loop header
LB: loop body
LE: loop exit
PB: predicated region body
PF: predicated region fallthrough
CT: control target
= control target key end

     0   :  { %s619_s18 = smov 0   ;;  %s711_s0 = inlined_call_operand.vmem [shape: f32[256,32], index: 0, kind: input, shape index: {}]   ;;  %s712_s1 = inlined_call_operand.vmem [shape: bf16[32,32], index: 1, kind: input, shape index: {}]   ;;  %s713_s2 = inlined_call_operand.vmem [shape: f32[1,32], index: 2, kind: input, shape index: {}]   ;;  %s714_s3 = inlined_call_operand.vmem [shape: bf16[32,32], index: 3, kind: input, shape index: {}]   ;;  %s715_s4 = inlined_call_operand.vmem [shape: f32[1,32], index: 4, kind: input, shape index: {}]   ;;  %s716_s5 = inlined_call_operand.vmem [shape: f32[256,32], index: 5, kind: output, shape index: {}]  }
   0x1 LB: > { %s520_s19 = sadd.s32 4294967295, %s587_s18   ;;  %p524_p0 = scmp.ge.s32.totalorder %s587_s18, 1  ;;  %s587_s18 = sphi %s619_s18, %s15_s18  }
   0x2   : > { %p188_p1 = scmp.lt.s32.totalorder %s587_s18, 3 }
   0x4   : > { %p189_p2 = pnand %p524_p0, %p188_p1 }
   0x5   : > { %s525_s22 = sshll.u32 (!%p189_p2), %s520_s19, 4 }
   0x6   : > { %192 = sbr.rel (%p189_p2) target bundleno = 354 (0x162), region = 40  ;;  %p217_p3 = scmp.lt.s32.totalorder (!%p189_p2), %s525_s22, 31 }
   0xb   : > { %v564_v0 = vld [vmem:[%s712_s1 + $0x8] sm:$0xff]  ;;  %v563_v1 = vld [vmem:[%s712_s1] sm:$0xff]  ;;  %s718_s22 = smov (!%p217_p3, %s525_s22), 31  ;;  %vm273_vm0 = vcmask 261120  }
   0xc   : > { %304 = vmatpush.bf16.msra.mxu0 %v564_v0  ;;  %567 = vmatpush.bf16.msra.mxu2 %v564_v0  ;;  %s526_s25 = sshll.u32 %s718_s22, 3  ;;  %v566_v26 = vld [vmem:[%s714_s3 + $0x8] sm:$0xff]  ;;  %v565_v27 = vld [vmem:[%s714_s3] sm:$0xff] }
   0xd   : > { %s220_s28 = scalar_lea.vmem %s711_s0, %s526_s25  ;;  %405 = vmatpush.bf16.msra.mxu1 %v566_v26  ;;  %569 = vmatpush.bf16.msra.mxu3 %v566_v26  ;;  %v579_v29 = vld [vmem:[%s713_s2] ss:$0 sm:$0xff]  ;;  %s674_s14 = scalar_lea.vmem %s716_s5, %s526_s25 }
   0xe   : > { %v229_v2 = vld [vmem:[%s220_s28] sm:$0xff]  ;;  %v230_v3 = vld [vmem:[%s220_s28 + $0x8] sm:$0xff]  ;;  %v231_v8 = vld [vmem:[%s220_s28 + $0x10] sm:$0xff] }
   0xf   : > { %v237_v4 = vld [vmem:[%s220_s28 + $0x40] sm:$0xff]  ;;  %v245_v5 = vpack.c.bf16 %v230_v3, %v229_v2  ;;  %v238_v6 = vld [vmem:[%s220_s28 + $0x48] sm:$0xff]  ;;  %v232_v9 = vld [vmem:[%s220_s28 + $0x18] sm:$0xff] }
  0x10   : > { %305 = vmatpush.bf16.msra.mxu0 %v563_v1  ;;  %568 = vmatpush.bf16.msra.mxu2 %v563_v1  ;;  %v249_v7 = vpack.c.bf16 %v238_v6, %v237_v4  ;;  %v239_v10 = vld [vmem:[%s220_s28 + $0x50] sm:$0xff]  ;;  %v240_v11 = vld [vmem:[%s220_s28 + $0x58] sm:$0xff]  ;;  %v246_v12 = vpack.c.bf16 %v232_v9, %v231_v8  ;;  %v233_v14 = vld [vmem:[%s220_s28 + $0x20] sm:$0xff] }
  0x11   : > { %v250_v13 = vpack.c.bf16 %v240_v11, %v239_v10  ;;  %v234_v15 = vld [vmem:[%s220_s28 + $0x28] sm:$0xff]  ;;  %v241_v16 = vld [vmem:[%s220_s28 + $0x60] sm:$0xff]  ;;  %v235_v20 = vld [vmem:[%s220_s28 + $0x30] sm:$0xff]  ;;  %406 = vmatpush.bf16.msra.mxu1 %v565_v27  ;;  %570 = vmatpush.bf16.msra.mxu3 %v565_v27 }
  0x12   : > { %v242_v17 = vld [vmem:[%s220_s28 + $0x68] sm:$0xff]  ;;  %v247_v18 = vpack.c.bf16 %v234_v15, %v233_v14  ;;  %v236_v21 = vld [vmem:[%s220_s28 + $0x38] sm:$0xff]  ;;  %v243_v22 = vld [vmem:[%s220_s28 + $0x70] sm:$0xff] }
  0x13   : > { %537 = vmatmul.msk.bf16.vlgmr.msra.gmra.mxu0 %vm273_vm0, %v245_v5  ;;  %541 = vmatmul.msk.bf16.vlgmr.msra.gmra.mxu2 %vm273_vm0, %v249_v7  ;;  %v251_v19 = vpack.c.bf16 %v242_v17, %v241_v16  ;;  %v244_v23 = vld [vmem:[%s220_s28 + $0x78] sm:$0xff]  ;;  %v248_v24 = vpack.c.bf16 %v236_v21, %v235_v20  ;;  %v580_v5 = vld [vmem:[%s715_s4] ss:$0 sm:$0xff] }
  0x14   : > { %v252_v25 = vpack.c.bf16 %v244_v23, %v243_v22 }
  0x23   : > { %538 = vmatmul.msk.bf16.gmra.mxu0 %vm273_vm0, %v246_v12  ;;  %542 = vmatmul.msk.bf16.gmra.mxu2 %vm273_vm0, %v250_v13 }
  0x33   : > { %539 = vmatmul.msk.bf16.gmra.mxu0 %vm273_vm0, %v247_v18  ;;  %543 = vmatmul.msk.bf16.gmra.mxu2 %vm273_vm0, %v251_v19 }
  0x43   : > { %540 = vmatmul.msk.bf16.gmra.mxu0 %vm273_vm0, %v248_v24  ;;  %544 = vmatmul.msk.bf16.gmra.mxu2 %vm273_vm0, %v252_v25 }
  0x90   : > { %v307_v28 = vpop.f32.mrf.mxu0 }
  0x91   : > { %v308_v30 = vadd.f32 %v579_v29, %v307_v28 }
  0x96   : > { %v327_v31 = vpop.f32.mrf.mxu2 }
  0x97   : > { %v328_v36 = vadd.f32 %v579_v29, %v327_v31 }
  0x98   : > { %v309_v32 = vpop.f32.mrf.mxu0 }
  0x99   : > { %v310_v33 = vadd.f32 %v579_v29, %v309_v32 }
  0x9b   : > { %v347_v34 = vpack.c.bf16 %v310_v33, %v308_v30 }
  0x9d   : > { %553 = vmatmul.msk.bf16.vlgmr.msra.gmra.mxu1 %vm273_vm0, %v347_v34 }
  0x9e   : > { %v329_v35 = vpop.f32.mrf.mxu2 }
  0x9f   : > { %v330_v37 = vadd.f32 %v579_v29, %v329_v35 }
  0xa0   : > { %v312_v38 = vpop.f32.mrf.mxu0 }
  0xa1   : > { %v351_v39 = vpack.c.bf16 %v330_v37, %v328_v36  ;;  %v313_v40 = vadd.f32 %v579_v29, %v312_v38 }
  0xa3   : > { %557 = vmatmul.msk.bf16.vlgmr.msra.gmra.mxu3 %vm273_vm0, %v351_v39 }
  0xa6   : > { %v332_v41 = vpop.f32.mrf.mxu2 }
  0xa7   : > { %v333_v46 = vadd.f32 %v579_v29, %v332_v41 }
  0xa8   : > { %v314_v42 = vpop.f32.mrf.mxu0 }
  0xa9   : > { %v315_v43 = vadd.f32 %v579_v29, %v314_v42 }
  0xab   : > { %v348_v44 = vpack.c.bf16 %v315_v43, %v313_v40 }
  0xad   : > { %554 = vmatmul.msk.bf16.gmra.mxu1 %vm273_vm0, %v348_v44 }
  0xae   : > { %v334_v45 = vpop.f32.mrf.mxu2 }
  0xaf   : > { %v335_v47 = vadd.f32 %v579_v29, %v334_v45 }
  0xb0   : > { %v317_v48 = vpop.f32.mrf.mxu0 }
  0xb1   : > { %v352_v49 = vpack.c.bf16 %v335_v47, %v333_v46  ;;  %v318_v50 = vadd.f32 %v579_v29, %v317_v48 }
  0xb3   : > { %558 = vmatmul.msk.bf16.gmra.mxu3 %vm273_vm0, %v352_v49 }
  0xb6   : > { %v337_v51 = vpop.f32.mrf.mxu2 }
  0xb7   : > { %v338_v56 = vadd.f32 %v579_v29, %v337_v51 }
  0xb8   : > { %v319_v52 = vpop.f32.mrf.mxu0 }
  0xb9   : > { %v320_v53 = vadd.f32 %v579_v29, %v319_v52 }
  0xbb   : > { %v349_v54 = vpack.c.bf16 %v320_v53, %v318_v50 }
  0xbd   : > { %555 = vmatmul.msk.bf16.gmra.mxu1 %vm273_vm0, %v349_v54 }
  0xbe   : > { %v339_v55 = vpop.f32.mrf.mxu2 }
  0xbf   : > { %v340_v57 = vadd.f32 %v579_v29, %v339_v55 }
  0xc0   : > { %v322_v58 = vpop.f32.mrf.mxu0 }
  0xc1   : > { %v353_v59 = vpack.c.bf16 %v340_v57, %v338_v56  ;;  %v323_v60 = vadd.f32 %v579_v29, %v322_v58 }
  0xc3   : > { %559 = vmatmul.msk.bf16.gmra.mxu3 %vm273_vm0, %v353_v59 }
  0xc6   : > { %v342_v61 = vpop.f32.mrf.mxu2 }
  0xc7   : > { %v343_v2 = vadd.f32 %v579_v29, %v342_v61 }
  0xc8   : > { %v324_v62 = vpop.f32.mrf.mxu0 }
  0xc9   : > { %v325_v63 = vadd.f32 %v579_v29, %v324_v62 }
  0xcb   : > { %v350_v0 = vpack.c.bf16 %v325_v63, %v323_v60 }
  0xcd   : > { %556 = vmatmul.msk.bf16.gmra.mxu1 %vm273_vm0, %v350_v0 }
  0xce   : > { %v344_v1 = vpop.f32.mrf.mxu2 }
  0xcf   : > { %v345_v3 = vadd.f32 %v579_v29, %v344_v1 }
  0xd1   : > { %v354_v4 = vpack.c.bf16 %v345_v3, %v343_v2 }
  0xd3   : > { %560 = vmatmul.msk.bf16.gmra.mxu3 %vm273_vm0, %v354_v4 }
 0x11a   : > { %v408_v6 = vpop.f32.mrf.mxu1 }
 0x11b   : > { %v409_v7 = vadd.f32 %v580_v5, %v408_v6 }
 0x11d   : > { %448 = vst.msk [vmem:[%s674_s14] sm:$0xff] %vm273_vm0, %v409_v7 }
 0x122   : > { %v410_v8 = vpop.f32.mrf.mxu1 }
 0x123   : > { %v411_v9 = vadd.f32 %v580_v5, %v410_v8 }
 0x125   : > { %449 = vst.msk [vmem:[%s674_s14 + $0x8] sm:$0xff] %vm273_vm0, %v411_v9 }
 0x126   : > { %v428_v10 = vpop.f32.mrf.mxu3 }
 0x127   : > { %v429_v11 = vadd.f32 %v580_v5, %v428_v10 }
 0x129   : > { %456 = vst.msk [vmem:[%s674_s14 + $0x40] sm:$0xff] %vm273_vm0, %v429_v11 }
 0x12a   : > { %v413_v12 = vpop.f32.mrf.mxu1 }
 0x12b   : > { %v414_v13 = vadd.f32 %v580_v5, %v413_v12 }
 0x12d   : > { %450 = vst.msk [vmem:[%s674_s14 + $0x10] sm:$0xff] %vm273_vm0, %v414_v13 }
 0x12e   : > { %v430_v14 = vpop.f32.mrf.mxu3 }
 0x12f   : > { %v431_v15 = vadd.f32 %v580_v5, %v430_v14 }
 0x131   : > { %457 = vst.msk [vmem:[%s674_s14 + $0x48] sm:$0xff] %vm273_vm0, %v431_v15 }
 0x132   : > { %v415_v16 = vpop.f32.mrf.mxu1 }
 0x133   : > { %v416_v17 = vadd.f32 %v580_v5, %v415_v16 }
 0x135   : > { %451 = vst.msk [vmem:[%s674_s14 + $0x18] sm:$0xff] %vm273_vm0, %v416_v17 }
 0x136   : > { %v433_v18 = vpop.f32.mrf.mxu3 }
 0x137   : > { %v434_v19 = vadd.f32 %v580_v5, %v433_v18 }
 0x139   : > { %458 = vst.msk [vmem:[%s674_s14 + $0x50] sm:$0xff] %vm273_vm0, %v434_v19 }
 0x13a   : > { %v418_v20 = vpop.f32.mrf.mxu1 }
 0x13b   : > { %v419_v21 = vadd.f32 %v580_v5, %v418_v20 }
 0x13d   : > { %452 = vst.msk [vmem:[%s674_s14 + $0x20] sm:$0xff] %vm273_vm0, %v419_v21 }
 0x13e   : > { %v435_v22 = vpop.f32.mrf.mxu3 }
 0x13f   : > { %v436_v23 = vadd.f32 %v580_v5, %v435_v22 }
 0x141   : > { %459 = vst.msk [vmem:[%s674_s14 + $0x58] sm:$0xff] %vm273_vm0, %v436_v23 }
 0x142   : > { %v420_v24 = vpop.f32.mrf.mxu1 }
 0x143   : > { %v421_v25 = vadd.f32 %v580_v5, %v420_v24 }
 0x145   : > { %453 = vst.msk [vmem:[%s674_s14 + $0x28] sm:$0xff] %vm273_vm0, %v421_v25 }
 0x146   : > { %v438_v26 = vpop.f32.mrf.mxu3 }
 0x147   : > { %v439_v27 = vadd.f32 %v580_v5, %v438_v26 }
 0x149   : > { %460 = vst.msk [vmem:[%s674_s14 + $0x60] sm:$0xff] %vm273_vm0, %v439_v27 }
 0x14a   : > { %v423_v28 = vpop.f32.mrf.mxu1 }
 0x14b   : > { %v424_v29 = vadd.f32 %v580_v5, %v423_v28 }
 0x14d   : > { %454 = vst.msk [vmem:[%s674_s14 + $0x30] sm:$0xff] %vm273_vm0, %v424_v29 }
 0x14e   : > { %v440_v30 = vpop.f32.mrf.mxu3 }
 0x14f   : > { %v441_v31 = vadd.f32 %v580_v5, %v440_v30 }
 0x151   : > { %461 = vst.msk [vmem:[%s674_s14 + $0x68] sm:$0xff] %vm273_vm0, %v441_v31 }
 0x152   : > { %v425_v32 = vpop.f32.mrf.mxu1 }
 0x153   : > { %v426_v33 = vadd.f32 %v580_v5, %v425_v32 }
 0x155   : > { %455 = vst.msk [vmem:[%s674_s14 + $0x38] sm:$0xff] %vm273_vm0, %v426_v33 }
 0x156   : > { %v443_v34 = vpop.f32.mrf.mxu3 }
 0x157   : > { %v444_v35 = vadd.f32 %v580_v5, %v443_v34 }
 0x159   : > { %462 = vst.msk [vmem:[%s674_s14 + $0x70] sm:$0xff] %vm273_vm0, %v444_v35 }
 0x15e   : > { %v445_v36 = vpop.f32.mrf.mxu3 }
 0x15f   : > { %v446_v37 = vadd.f32 %v580_v5, %v445_v36 }
 0x161   : > { %463 = vst.msk [vmem:[%s674_s14 + $0x78] sm:$0xff] %vm273_vm0, %v446_v37 }
 0x162 PF: > { %s15_s18 = sadd.s32 1, %s587_s18  }
 0x163   : > { %p12_p4 = scmp.ge.s32.totalorder %s15_s18, 4  }
 0x165   :  { %14 = sbr.rel (!%p12_p4) target bundleno = 1 (0x1), region = 70 }

</bundles_post_ra>
